<compile_context>
chip_gen: v7x
topology: tpu7x:2x2x1
jax: 0.10.0
libtpu: 0.0.40
codegen_flags: <defaults>
</compile_context>

<pallas_src>
import math

import jax
import jax.numpy as jnp
from jax.experimental import pallas as pl
from jax.experimental.pallas import tpu as pltpu

_LN_EPS = 1e-6

_COMPILER_PARAMS = pltpu.CompilerParams(
    dimension_semantics=("parallel", "parallel"),
    vmem_limit_bytes=32 * 1024 * 1024,
)


# ----------------------------------------------------------------------------
# In-kernel helpers
# ----------------------------------------------------------------------------
def _layernorm(v, gamma, beta):
    """PyTorch-module LayerNorm: a * (v - mean) / (std_unbiased + eps) + b  (f32)."""
    d = v.shape[-1]
    mean = jnp.mean(v, axis=-1, keepdims=True)
    c = v - mean
    var = jnp.sum(c * c, axis=-1, keepdims=True) / (d - 1)   # torch.std default: unbiased
    std = jnp.sqrt(var)
    return gamma * c / (std + _LN_EPS) + beta


# ----------------------------------------------------------------------------
# Fused attention + add&norm kernel
# ----------------------------------------------------------------------------
def _attn_addnorm_compute(xq_ref, xkv_ref, mask_ref,
                          wq_ref, bq_ref, wk_ref, bk_ref, wv_ref, bv_ref,
                          wo_ref, bo_ref, gamma_ref, beta_ref, out_ref):
    """Self-attention + residual + LayerNorm for one (batch, q-tile) block."""
    xq = xq_ref[0]                                    # (TQ, D) f32 residual
    h, d, dk = wq_ref.shape                           # (H, D, dk) bf16
    tq = xq.shape[0]
    scale = 1.0 / math.sqrt(dk)

    # Heads as a leading batch axis (no in-kernel reshape/transpose of activations).
    xq16 = jnp.broadcast_to(xq.astype(jnp.bfloat16)[None], (h, tq, d))
    if xkv_ref is xq_ref:                             # shared K/V source (S == TQ)
        xkv16 = xq16
        s = tq
    else:
        xkv = xkv_ref[0]                              # (S, D) f32
        s = xkv.shape[0]
        xkv16 = jnp.broadcast_to(xkv.astype(jnp.bfloat16)[None], (h, s, d))

    # Per-head projections: head-batched bf16 matmuls, f32 accumulation.
    q = jnp.einsum("hqd,hdk->hqk", xq16, wq_ref[...],
                   preferred_element_type=jnp.float32) + bq_ref[...]      # (H, TQ, dk)
    k = jnp.einsum("htd,hdk->htk", xkv16, wk_ref[...],
                   preferred_element_type=jnp.float32) + bk_ref[...]      # (H, S, dk)
    v = jnp.einsum("htd,hdk->htk", xkv16, wv_ref[...],
                   preferred_element_type=jnp.float32) + bv_ref[...]      # (H, S, dk)

    scores = jnp.einsum("hqk,htk->hqt",
                        q.astype(jnp.bfloat16), k.astype(jnp.bfloat16),
                        preferred_element_type=jnp.float32) * scale       # (H, TQ, S)

    if mask_ref is not None:
        m = mask_ref[0, 0]                            # (1, S) or (TQ, S); 0.0 => masked
        scores = jnp.where(m == 0.0, -1e9, scores)

    # Softmax (f32 statistics); divide moved to the EUP via approximate reciprocal.
    smax = jnp.max(scores, axis=-1, keepdims=True)
    p = jnp.exp(scores - smax)
    denom = jnp.sum(p, axis=-1, keepdims=True)
    attn = p * pl.reciprocal(denom, approx=True)

    ctx = jnp.einsum("hqt,htk->hqk",
                     attn.astype(jnp.bfloat16), v.astype(jnp.bfloat16),
                     preferred_element_type=jnp.float32)                  # (H, TQ, dk)

    # Output projection: per-head (dk x D) blocks, then sum heads (leading-axis reduce).
    outh = jnp.einsum("hqk,hkd->hqd",
                      ctx.astype(jnp.bfloat16), wo_ref[...],
                      preferred_element_type=jnp.float32)                 # (H, TQ, D)
    attn_out = jnp.sum(outh, axis=0) + bo_ref[...]                        # (TQ, D)

    # Fused residual + LayerNorm epilogue (f32).
    out_ref[0] = _layernorm(xq + attn_out, gamma_ref[...], beta_ref[...])


def _make_attn_kernel(has_mask: bool, shared_kv: bool):
    def kernel(*refs):
        i = 0
        xq_ref = refs[i]; i += 1
        if shared_kv:
            xkv_ref = xq_ref
        else:
            xkv_ref = refs[i]; i += 1
        mask_ref = None
        if has_mask:
            mask_ref = refs[i]; i += 1
        _attn_addnorm_compute(xq_ref, xkv_ref, mask_ref, *refs[i:])
    return kernel


# ----------------------------------------------------------------------------
# Fused FFN + add&norm kernel
# ----------------------------------------------------------------------------
def _ffn_addnorm_kernel(x_ref, w1_ref, b1_ref, w2_ref, b2_ref,
                        gamma_ref, beta_ref, out_ref):
    """FFN + residual + LayerNorm for one (batch, seq-tile) block."""
    x = x_ref[0]                                                          # (TS, D) f32
    hmid = jnp.dot(x.astype(jnp.bfloat16), w1_ref[...],
                   preferred_element_type=jnp.float32) + b1_ref[...]      # (TS, d_ff)
    hmid = jnp.maximum(hmid, 0.0)
    y = jnp.dot(hmid.astype(jnp.bfloat16), w2_ref[...],
                preferred_element_type=jnp.float32) + b2_ref[...]         # (TS, D)
    # Original forward: x = ff(x); x = norm_2(x + dropout_2(x))  ->  LN(y + y) in eval mode.
    out_ref[0] = _layernorm(y + y, gamma_ref[...], beta_ref[...])


# ----------------------------------------------------------------------------
# pallas_call wrappers
# ----------------------------------------------------------------------------
def _full_spec(shape):
    n = len(shape)
    return pl.BlockSpec(shape, lambda *_: (0,) * n)


def mha_addnorm(x, mask, wq, bq, wk, bk, wv, bv, wo, bo, gamma, beta, num_heads):
    B, S, D = x.shape
    H = num_heads
    assert D % H == 0, "d_model must be divisible by num_heads"
    dk = D // H

    # Query-tile size: whole sequence when it fits, else 128 (require divisibility).
    if S <= 128:
        TQ = S
    elif S % 128 == 0:
        TQ = 128
    else:
        TQ = S
    nq = S // TQ
    shared_kv = (nq == 1)

    # Host-side re-layout: heads as leading axis; matmul weights in bf16, biases f32.
    wq3 = wq.reshape(D, H, dk).transpose(1, 0, 2).astype(jnp.bfloat16)    # (H, D, dk)
    wk3 = wk.reshape(D, H, dk).transpose(1, 0, 2).astype(jnp.bfloat16)
    wv3 = wv.reshape(D, H, dk).transpose(1, 0, 2).astype(jnp.bfloat16)
    wo3 = wo.reshape(H, dk, D).astype(jnp.bfloat16)                       # (H, dk, D)
    bq3 = bq.reshape(H, 1, dk)
    bk3 = bk.reshape(H, 1, dk)
    bv3 = bv.reshape(H, 1, dk)

    x_specs = [pl.BlockSpec((1, TQ, D), lambda b, qi: (b, qi, 0))]        # query / residual
    x_args = (x,)
    if not shared_kv:                                                     # full-seq K/V source
        x_specs.append(pl.BlockSpec((1, S, D), lambda b, qi: (b, 0, 0)))
        x_args = (x, x)

    w_specs = [
        _full_spec((H, D, dk)), _full_spec((H, 1, dk)),       # wq, bq
        _full_spec((H, D, dk)), _full_spec((H, 1, dk)),       # wk, bk
        _full_spec((H, D, dk)), _full_spec((H, 1, dk)),       # wv, bv
        _full_spec((H, dk, D)), _full_spec((1, D)),           # wo, bo
        _full_spec((1, D)), _full_spec((1, D)),               # gamma, beta
    ]
    w_args = (wq3, bq3, wk3, bk3, wv3, bv3, wo3, bo, gamma, beta)

    if mask is None:
        in_specs = x_specs + w_specs
        args = x_args + w_args
    else:
        if mask.shape[2] == 1:                                # (B, 1, 1, S) padding mask
            mspec = pl.BlockSpec((1, 1, 1, S), lambda b, qi: (b, 0, 0, 0))
        else:                                                 # (B, 1, S, S) full mask
            mspec = pl.BlockSpec((1, 1, TQ, S), lambda b, qi: (b, 0, qi, 0))
        in_specs = x_specs + [mspec] + w_specs
        args = x_args + (mask.astype(jnp.float32),) + w_args

    kernel = _make_attn_kernel(has_mask=(mask is not None), shared_kv=shared_kv)

    return pl.pallas_call(
        kernel,
        out_shape=jax.ShapeDtypeStruct((B, S, D), jnp.float32),
        grid=(B, nq),
        in_specs=in_specs,
        out_specs=pl.BlockSpec((1, TQ, D), lambda b, qi: (b, qi, 0)),
        compiler_params=_COMPILER_PARAMS,
    )(*args)


def ffn_addnorm(x, w1, b1, w2, b2, gamma, beta):
    B, S, D = x.shape
    d_ff = w1.shape[1]
    if S <= 256:
        TS = S
    elif S % 256 == 0:
        TS = 256
    else:
        TS = S
    ns = S // TS
    return pl.pallas_call(
        _ffn_addnorm_kernel,
        out_shape=jax.ShapeDtypeStruct((B, S, D), jnp.float32),
        grid=(B, ns),
        in_specs=[
            pl.BlockSpec((1, TS, D), lambda b, si: (b, si, 0)),
            _full_spec((D, d_ff)), _full_spec((1, d_ff)),
            _full_spec((d_ff, D)), _full_spec((1, D)),
            _full_spec((1, D)), _full_spec((1, D)),
        ],
        out_specs=pl.BlockSpec((1, TS, D), lambda b, si: (b, si, 0)),
        compiler_params=_COMPILER_PARAMS,
    )(x, w1.astype(jnp.bfloat16), b1, w2.astype(jnp.bfloat16), b2, gamma, beta)


def encoder_layer(x, params, num_heads, src_mask=None):
    """EncoderLayer.forward — dropout layers are identity (eval mode)."""
    g1, bt1 = params["norm_1"]
    x = mha_addnorm(x, src_mask, *params["attn"], g1, bt1, num_heads)
    g2, bt2 = params["norm_2"]
    x = ffn_addnorm(x, *params["ff"], g2, bt2)
    return x


# ----------------------------------------------------------------------------
# Pure-JAX f32 reference (for correctness check)
# ----------------------------------------------------------------------------
def _mha_ref(x, mask, wq, bq, wk, bk, wv, bv, wo, bo, h):
    B, S, D = x.shape
    dk = D // h
    q = (x @ wq + bq).reshape(B, S, h, dk).transpose(0, 2, 1, 3)
    k = (x @ wk + bk).reshape(B, S, h, dk).transpose(0, 2, 1, 3)
    v = (x @ wv + bv).reshape(B, S, h, dk).transpose(0, 2, 1, 3)
    scores = jnp.einsum("bhqd,bhkd->bhqk", q, k) / math.sqrt(dk)
    if mask is not None:
        scores = jnp.where(mask == 0.0, -1e9, scores)
    attn = jax.nn.softmax(scores, axis=-1)
    out = jnp.einsum("bhqk,bhkd->bhqd", attn, v)
    out = out.transpose(0, 2, 1, 3).reshape(B, S, D)
    return out @ wo + bo


def _ln_ref(v, a, b):
    mean = jnp.mean(v, axis=-1, keepdims=True)
    std = jnp.std(v, axis=-1, keepdims=True, ddof=1)
    return a * (v - mean) / (std + _LN_EPS) + b


def encoder_layer_ref(x, params, num_heads, src_mask=None):
    out = _mha_ref(x, src_mask, *params["attn"], num_heads)
    x = _ln_ref(x + out, *params["norm_1"])
    w1, b1, w2, b2 = params["ff"]
    y = jnp.maximum(x @ w1 + b1, 0.0) @ w2 + b2
    x = _ln_ref(y + y, *params["norm_2"])          # literal original-forward semantics
    return x


# ----------------------------------------------------------------------------
# Parameter init + demo
# ----------------------------------------------------------------------------
def init_params(key, d_model, d_ff):
    keys = jax.random.split(key, 6)

    def lin(k, fan_in, fan_out):
        w = jax.random.normal(k, (fan_in, fan_out), jnp.float32) * 0.02
        b = jnp.zeros((1, fan_out), jnp.float32)
        return w, b

    wq, bq = lin(keys[0], d_model, d_model)
    wk, bk = lin(keys[1], d_model, d_model)
    wv, bv = lin(keys[2], d_model, d_model)
    wo, bo = lin(keys[3], d_model, d_model)
    w1, b1 = lin(keys[4], d_model, d_ff)
    w2, b2 = lin(keys[5], d_ff, d_model)

    def ln():
        return (jnp.ones((1, d_model), jnp.float32), jnp.zeros((1, d_model), jnp.float32))

    return {
        "attn": (wq, bq, wk, bk, wv, bv, wo, bo),
        "ff": (w1, b1, w2, b2),
        "norm_1": ln(),
        "norm_2": ln(),
    }


if __name__ == "__main__":
    B, S = 2, 8
    D_MODEL, NUM_HEADS, D_FF = 32, 4, 64

    key = jax.random.PRNGKey(0)
    k_x, k_p = jax.random.split(key, 2)

    x = jax.random.normal(k_x, (B, S, D_MODEL), jnp.float32)
    params = init_params(k_p, D_MODEL, D_FF)

    # Padding src_mask (B, 1, 1, S): batch 0 uses all tokens, batch 1 masks the last 2 keys.
    lengths = jnp.array([S, S - 2])
    src_mask = (jnp.arange(S)[None, :] < lengths[:, None]).astype(jnp.float32)
    src_mask = src_mask[:, None, None, :]

    out_masked = jax.block_until_ready(encoder_layer(x, params, NUM_HEADS, src_mask))
    out_nomask = jax.block_until_ready(encoder_layer(x, params, NUM_HEADS, None))

    ref_masked = encoder_layer_ref(x, params, NUM_HEADS, src_mask)
    ref_nomask = encoder_layer_ref(x, params, NUM_HEADS, None)

    assert out_masked.shape == (B, S, D_MODEL)
    # bf16 MXU operands (f32 accumulation) + approx reciprocal vs an all-f32 reference.
    assert jnp.allclose(out_masked, ref_masked, atol=3e-2, rtol=3e-2), (
        "masked output mismatch, max |diff| = %e"
        % float(jnp.max(jnp.abs(out_masked - ref_masked))))
    assert jnp.allclose(out_nomask, ref_nomask, atol=3e-2, rtol=3e-2), (
        "no-mask output mismatch, max |diff| = %e"
        % float(jnp.max(jnp.abs(out_nomask - ref_nomask))))

    print("KERNEL_OK")
</pallas_src>

<mosaic_0001>
module attributes {stable_mosaic.version = 11 : i64} {
  func.func @kernel(%arg0: i32, %arg1: i32, %arg2: memref<1x8x32xf32, #tpu.memory_space<vmem>>, %arg3: memref<1x1x1x8xf32, #tpu.memory_space<vmem>>, %arg4: memref<4x32x8xbf16, #tpu.memory_space<vmem>>, %arg5: memref<4x1x8xf32, #tpu.memory_space<vmem>>, %arg6: memref<4x32x8xbf16, #tpu.memory_space<vmem>>, %arg7: memref<4x1x8xf32, #tpu.memory_space<vmem>>, %arg8: memref<4x32x8xbf16, #tpu.memory_space<vmem>>, %arg9: memref<4x1x8xf32, #tpu.memory_space<vmem>>, %arg10: memref<4x8x32xbf16, #tpu.memory_space<vmem>>, %arg11: memref<1x32xf32, #tpu.memory_space<vmem>>, %arg12: memref<1x32xf32, #tpu.memory_space<vmem>>, %arg13: memref<1x32xf32, #tpu.memory_space<vmem>>, %arg14: memref<1x8x32xf32, #tpu.memory_space<vmem>>) attributes {dimension_semantics = [#tpu.dimension_semantics<parallel>, #tpu.dimension_semantics<parallel>], iteration_bounds = array<i64: 2, 1>, scalar_prefetch = 0 : i64, scratch_operands = 0 : i64, tpu.core_type = #tpu.core_type<tc>, window_params = [{transform_indices = @transform_0, window_bounds = array<i64: 1, 8, 32>}, {transform_indices = @transform_1, window_bounds = array<i64: 1, 1, 1, 8>}, {pipeline_mode = #tpu.pipeline_mode<synchronous>, transform_indices = @transform_2, window_bounds = array<i64: 4, 32, 8>}, {pipeline_mode = #tpu.pipeline_mode<synchronous>, transform_indices = @transform_3, window_bounds = array<i64: 4, 1, 8>}, {pipeline_mode = #tpu.pipeline_mode<synchronous>, transform_indices = @transform_4, window_bounds = array<i64: 4, 32, 8>}, {pipeline_mode = #tpu.pipeline_mode<synchronous>, transform_indices = @transform_5, window_bounds = array<i64: 4, 1, 8>}, {pipeline_mode = #tpu.pipeline_mode<synchronous>, transform_indices = @transform_6, window_bounds = array<i64: 4, 32, 8>}, {pipeline_mode = #tpu.pipeline_mode<synchronous>, transform_indices = @transform_7, window_bounds = array<i64: 4, 1, 8>}, {pipeline_mode = #tpu.pipeline_mode<synchronous>, transform_indices = @transform_8, window_bounds = array<i64: 4, 8, 32>}, {pipeline_mode = #tpu.pipeline_mode<synchronous>, transform_indices = @transform_9, window_bounds = array<i64: 1, 32>}, {pipeline_mode = #tpu.pipeline_mode<synchronous>, transform_indices = @transform_10, window_bounds = array<i64: 1, 32>}, {pipeline_mode = #tpu.pipeline_mode<synchronous>, transform_indices = @transform_11, window_bounds = array<i64: 1, 32>}, {transform_indices = @transform_12, window_bounds = array<i64: 1, 8, 32>}]} {
    %c0 = arith.constant 0 : index
    %c0_0 = arith.constant 0 : index
    %c0_1 = arith.constant 0 : index
    %0 = vector.load %arg2[%c0, %c0_0, %c0_1] : memref<1x8x32xf32, #tpu.memory_space<vmem>>, vector<1x8x32xf32>
    %1 = vector.shape_cast %0 : vector<1x8x32xf32> to vector<8x32xf32>
    %2 = arith.truncf %1 : vector<8x32xf32> to vector<8x32xbf16>
    %3 = vector.shape_cast %2 : vector<8x32xbf16> to vector<1x8x32xbf16>
    %4 = vector.shape_cast %3 : vector<1x8x32xbf16> to vector<1x8x32xbf16>
    %5 = vector.broadcast %4 : vector<1x8x32xbf16> to vector<4x8x32xbf16>
    %c0_2 = arith.constant 0 : index
    %c0_3 = arith.constant 0 : index
    %c0_4 = arith.constant 0 : index
    %6 = vector.load %arg4[%c0_2, %c0_3, %c0_4] : memref<4x32x8xbf16, #tpu.memory_space<vmem>>, vector<4x32x8xbf16>
    "tpu.trace_start"() <{level = 10 : i32, message = "hqd,hdk->hqk"}> : () -> ()
    %cst = arith.constant dense<0.000000e+00> : vector<4x8x8xf32>
    %7 = tpu.matmul %5, %6, %cst {dimension_numbers = #tpu.dot_dimension_numbers<[2], [1], [1], [2], [0, 0, 0, 1, 1, 2], [0], [0]>} : vector<4x8x32xbf16>, vector<4x32x8xbf16>, vector<4x8x8xf32> -> vector<4x8x8xf32>
    "tpu.trace_stop"() : () -> ()
    %c0_5 = arith.constant 0 : index
    %c0_6 = arith.constant 0 : index
    %c0_7 = arith.constant 0 : index
    %8 = vector.load %arg5[%c0_5, %c0_6, %c0_7] : memref<4x1x8xf32, #tpu.memory_space<vmem>>, vector<4x1x8xf32>
    %9 = vector.broadcast %8 : vector<4x1x8xf32> to vector<4x8x8xf32>
    %10 = arith.addf %7, %9 : vector<4x8x8xf32>
    %c0_8 = arith.constant 0 : index
    %c0_9 = arith.constant 0 : index
    %c0_10 = arith.constant 0 : index
    %11 = vector.load %arg6[%c0_8, %c0_9, %c0_10] : memref<4x32x8xbf16, #tpu.memory_space<vmem>>, vector<4x32x8xbf16>
    "tpu.trace_start"() <{level = 10 : i32, message = "htd,hdk->htk"}> : () -> ()
    %cst_11 = arith.constant dense<0.000000e+00> : vector<4x8x8xf32>
    %12 = tpu.matmul %5, %11, %cst_11 {dimension_numbers = #tpu.dot_dimension_numbers<[2], [1], [1], [2], [0, 0, 0, 1, 1, 2], [0], [0]>} : vector<4x8x32xbf16>, vector<4x32x8xbf16>, vector<4x8x8xf32> -> vector<4x8x8xf32>
    "tpu.trace_stop"() : () -> ()
    %c0_12 = arith.constant 0 : index
    %c0_13 = arith.constant 0 : index
    %c0_14 = arith.constant 0 : index
    %13 = vector.load %arg7[%c0_12, %c0_13, %c0_14] : memref<4x1x8xf32, #tpu.memory_space<vmem>>, vector<4x1x8xf32>
    %14 = vector.broadcast %13 : vector<4x1x8xf32> to vector<4x8x8xf32>
    %15 = arith.addf %12, %14 : vector<4x8x8xf32>
    %c0_15 = arith.constant 0 : index
    %c0_16 = arith.constant 0 : index
    %c0_17 = arith.constant 0 : index
    %16 = vector.load %arg8[%c0_15, %c0_16, %c0_17] : memref<4x32x8xbf16, #tpu.memory_space<vmem>>, vector<4x32x8xbf16>
    "tpu.trace_start"() <{level = 10 : i32, message = "htd,hdk->htk"}> : () -> ()
    %cst_18 = arith.constant dense<0.000000e+00> : vector<4x8x8xf32>
    %17 = tpu.matmul %5, %16, %cst_18 {dimension_numbers = #tpu.dot_dimension_numbers<[2], [1], [1], [2], [0, 0, 0, 1, 1, 2], [0], [0]>} : vector<4x8x32xbf16>, vector<4x32x8xbf16>, vector<4x8x8xf32> -> vector<4x8x8xf32>
    "tpu.trace_stop"() : () -> ()
    %c0_19 = arith.constant 0 : index
    %c0_20 = arith.constant 0 : index
    %c0_21 = arith.constant 0 : index
    %18 = vector.load %arg9[%c0_19, %c0_20, %c0_21] : memref<4x1x8xf32, #tpu.memory_space<vmem>>, vector<4x1x8xf32>
    %19 = vector.broadcast %18 : vector<4x1x8xf32> to vector<4x8x8xf32>
    %20 = arith.addf %17, %19 : vector<4x8x8xf32>
    %21 = arith.truncf %10 : vector<4x8x8xf32> to vector<4x8x8xbf16>
    %22 = arith.truncf %15 : vector<4x8x8xf32> to vector<4x8x8xbf16>
    "tpu.trace_start"() <{level = 10 : i32, message = "hqk,htk->hqt"}> : () -> ()
    %cst_22 = arith.constant dense<0.000000e+00> : vector<4x8x8xf32>
    %23 = tpu.matmul %21, %22, %cst_22 {dimension_numbers = #tpu.dot_dimension_numbers<[2], [2], [1], [1], [0, 0, 0, 1, 1, 1], [0], [0]>} : vector<4x8x8xbf16>, vector<4x8x8xbf16>, vector<4x8x8xf32> -> vector<4x8x8xf32>
    "tpu.trace_stop"() : () -> ()
    %cst_23 = arith.constant 0.353553385 : f32
    %24 = vector.broadcast %cst_23 : f32 to vector<4x8x8xf32>
    %25 = arith.mulf %23, %24 : vector<4x8x8xf32>
    %c0_24 = arith.constant 0 : index
    %c0_25 = arith.constant 0 : index
    %c0_26 = arith.constant 0 : index
    %c0_27 = arith.constant 0 : index
    %26 = vector.load %arg3[%c0_24, %c0_25, %c0_26, %c0_27] : memref<1x1x1x8xf32, #tpu.memory_space<vmem>>, vector<1x1x1x8xf32>
    %27 = vector.shape_cast %26 : vector<1x1x1x8xf32> to vector<1x8xf32>
    %cst_28 = arith.constant 0.000000e+00 : f32
    %28 = vector.broadcast %cst_28 : f32 to vector<1x8xf32>
    %29 = arith.cmpf oeq, %27, %28 : vector<1x8xf32>
    %cst_29 = arith.constant -1.000000e+09 : f32
    %30 = vector.shape_cast %29 : vector<1x8xi1> to vector<1x1x8xi1>
    %31 = vector.broadcast %30 : vector<1x1x8xi1> to vector<4x8x8xi1>
    %32 = vector.broadcast %cst_29 : f32 to vector<4x8x8xf32>
    %33 = arith.select %31, %32, %25 : vector<4x8x8xi1>, vector<4x8x8xf32>
    %cst_30 = arith.constant dense<0xFF800000> : vector<4x8xf32>
    %34 = vector.multi_reduction <maximumf>, %33, %cst_30 [2] : vector<4x8x8xf32> to vector<4x8xf32>
    %35 = vector.shape_cast %34 : vector<4x8xf32> to vector<4x8x1xf32>
    %36 = vector.broadcast %35 : vector<4x8x1xf32> to vector<4x8x8xf32>
    %37 = arith.subf %33, %36 : vector<4x8x8xf32>
    %38 = math.exp %37 : vector<4x8x8xf32>
    %cst_31 = arith.constant dense<0.000000e+00> : vector<4x8xf32>
    %39 = vector.multi_reduction <add>, %38, %cst_31 [2] : vector<4x8x8xf32> to vector<4x8xf32>
    %40 = vector.shape_cast %39 : vector<4x8xf32> to vector<4x8x1xf32>
    %41 = tpu.reciprocal %40 {approx = true} : vector<4x8x1xf32> -> vector<4x8x1xf32>
    %42 = vector.broadcast %41 : vector<4x8x1xf32> to vector<4x8x8xf32>
    %43 = arith.mulf %38, %42 : vector<4x8x8xf32>
    %44 = arith.truncf %43 : vector<4x8x8xf32> to vector<4x8x8xbf16>
    %45 = arith.truncf %20 : vector<4x8x8xf32> to vector<4x8x8xbf16>
    "tpu.trace_start"() <{level = 10 : i32, message = "hqt,htk->hqk"}> : () -> ()
    %cst_32 = arith.constant dense<0.000000e+00> : vector<4x8x8xf32>
    %46 = tpu.matmul %44, %45, %cst_32 {dimension_numbers = #tpu.dot_dimension_numbers<[2], [1], [1], [2], [0, 0, 0, 1, 1, 2], [0], [0]>} : vector<4x8x8xbf16>, vector<4x8x8xbf16>, vector<4x8x8xf32> -> vector<4x8x8xf32>
    "tpu.trace_stop"() : () -> ()
    %47 = arith.truncf %46 : vector<4x8x8xf32> to vector<4x8x8xbf16>
    %c0_33 = arith.constant 0 : index
    %c0_34 = arith.constant 0 : index
    %c0_35 = arith.constant 0 : index
    %48 = vector.load %arg10[%c0_33, %c0_34, %c0_35] : memref<4x8x32xbf16, #tpu.memory_space<vmem>>, vector<4x8x32xbf16>
    "tpu.trace_start"() <{level = 10 : i32, message = "hqk,hkd->hqd"}> : () -> ()
    %cst_36 = arith.constant dense<0.000000e+00> : vector<4x8x32xf32>
    %49 = tpu.matmul %47, %48, %cst_36 {dimension_numbers = #tpu.dot_dimension_numbers<[2], [1], [1], [2], [0, 0, 0, 1, 1, 2], [0], [0]>} : vector<4x8x8xbf16>, vector<4x8x32xbf16>, vector<4x8x32xf32> -> vector<4x8x32xf32>
    "tpu.trace_stop"() : () -> ()
    %cst_37 = arith.constant dense<0.000000e+00> : vector<8x32xf32>
    %50 = vector.multi_reduction <add>, %49, %cst_37 [0] : vector<4x8x32xf32> to vector<8x32xf32>
    %c0_38 = arith.constant 0 : index
    %c0_39 = arith.constant 0 : index
    %51 = vector.load %arg11[%c0_38, %c0_39] : memref<1x32xf32, #tpu.memory_space<vmem>>, vector<1x32xf32>
    %52 = vector.broadcast %51 : vector<1x32xf32> to vector<8x32xf32>
    %53 = arith.addf %50, %52 : vector<8x32xf32>
    %54 = arith.addf %1, %53 : vector<8x32xf32>
    %c0_40 = arith.constant 0 : index
    %c0_41 = arith.constant 0 : index
    %55 = vector.load %arg12[%c0_40, %c0_41] : memref<1x32xf32, #tpu.memory_space<vmem>>, vector<1x32xf32>
    %c0_42 = arith.constant 0 : index
    %c0_43 = arith.constant 0 : index
    %56 = vector.load %arg13[%c0_42, %c0_43] : memref<1x32xf32, #tpu.memory_space<vmem>>, vector<1x32xf32>
    %cst_44 = arith.constant dense<0.000000e+00> : vector<8xf32>
    %57 = vector.multi_reduction <add>, %54, %cst_44 [1] : vector<8x32xf32> to vector<8xf32>
    %58 = vector.shape_cast %57 : vector<8xf32> to vector<8x1xf32>
    %cst_45 = arith.constant 3.200000e+01 : f32
    %59 = vector.broadcast %cst_45 : f32 to vector<8x1xf32>
    %60 = arith.divf %58, %59 : vector<8x1xf32>
    %61 = vector.broadcast %60 : vector<8x1xf32> to vector<8x32xf32>
    %62 = arith.subf %54, %61 : vector<8x32xf32>
    %63 = arith.mulf %62, %62 : vector<8x32xf32>
    %cst_46 = arith.constant dense<0.000000e+00> : vector<8xf32>
    %64 = vector.multi_reduction <add>, %63, %cst_46 [1] : vector<8x32xf32> to vector<8xf32>
    %65 = vector.shape_cast %64 : vector<8xf32> to vector<8x1xf32>
    %cst_47 = arith.constant 3.100000e+01 : f32
    %66 = vector.broadcast %cst_47 : f32 to vector<8x1xf32>
    %67 = arith.divf %65, %66 : vector<8x1xf32>
    %68 = math.sqrt %67 : vector<8x1xf32>
    %69 = vector.broadcast %55 : vector<1x32xf32> to vector<8x32xf32>
    %70 = arith.mulf %69, %62 : vector<8x32xf32>
    %cst_48 = arith.constant 9.99999997E-7 : f32
    %71 = vector.broadcast %cst_48 : f32 to vector<8x1xf32>
    %72 = arith.addf %68, %71 : vector<8x1xf32>
    %73 = vector.broadcast %72 : vector<8x1xf32> to vector<8x32xf32>
    %74 = arith.divf %70, %73 : vector<8x32xf32>
    %75 = vector.broadcast %56 : vector<1x32xf32> to vector<8x32xf32>
    %76 = arith.addf %74, %75 : vector<8x32xf32>
    %c0_49 = arith.constant 0 : index
    %c0_50 = arith.constant 0 : index
    %c0_51 = arith.constant 0 : index
    %77 = vector.load %arg14[%c0_49, %c0_50, %c0_51] : memref<1x8x32xf32, #tpu.memory_space<vmem>>, vector<1x8x32xf32>
    %78 = vector.shape_cast %77 : vector<1x8x32xf32> to vector<8x32xf32>
    %79 = vector.shape_cast %76 : vector<8x32xf32> to vector<1x8x32xf32>
    tpu.vector_store %arg14[%c0_49, %c0_50, %c0_51], %79 {strides = array<i32>} : memref<1x8x32xf32, #tpu.memory_space<vmem>>, vector<1x8x32xf32>,
    return
  }
  func.func @transform_0(%arg0: i32, %arg1: i32) -> (i32, i32, i32) {
    %c0_i32 = arith.constant 0 : i32
    %c0_i32_0 = arith.constant 0 : i32
    return %arg0, %arg1, %c0_i32 : i32, i32, i32
  }
  func.func @transform_1(%arg0: i32, %arg1: i32) -> (i32, i32, i32, i32) {
    %c0_i32 = arith.constant 0 : i32
    %c0_i32_0 = arith.constant 0 : i32
    %c0_i32_1 = arith.constant 0 : i32
    %c0_i32_2 = arith.constant 0 : i32
    return %arg0, %c0_i32, %c0_i32_0, %c0_i32_1 : i32, i32, i32, i32
  }
  func.func @transform_2(%arg0: i32, %arg1: i32) -> (i32, i32, i32) {
    %c0_i32 = arith.constant 0 : i32
    %c0_i32_0 = arith.constant 0 : i32
    %c0_i32_1 = arith.constant 0 : i32
    %c0_i32_2 = arith.constant 0 : i32
    return %c0_i32, %c0_i32_0, %c0_i32_1 : i32, i32, i32
  }
  func.func @transform_3(%arg0: i32, %arg1: i32) -> (i32, i32, i32) {
    %c0_i32 = arith.constant 0 : i32
    %c0_i32_0 = arith.constant 0 : i32
    %c0_i32_1 = arith.constant 0 : i32
    %c0_i32_2 = arith.constant 0 : i32
    return %c0_i32, %c0_i32_0, %c0_i32_1 : i32, i32, i32
  }
  func.func @transform_4(%arg0: i32, %arg1: i32) -> (i32, i32, i32) {
    %c0_i32 = arith.constant 0 : i32
    %c0_i32_0 = arith.constant 0 : i32
    %c0_i32_1 = arith.constant 0 : i32
    %c0_i32_2 = arith.constant 0 : i32
    return %c0_i32, %c0_i32_0, %c0_i32_1 : i32, i32, i32
  }
  func.func @transform_5(%arg0: i32, %arg1: i32) -> (i32, i32, i32) {
    %c0_i32 = arith.constant 0 : i32
    %c0_i32_0 = arith.constant 0 : i32
    %c0_i32_1 = arith.constant 0 : i32
    %c0_i32_2 = arith.constant 0 : i32
    return %c0_i32, %c0_i32_0, %c0_i32_1 : i32, i32, i32
  }
  func.func @transform_6(%arg0: i32, %arg1: i32) -> (i32, i32, i32) {
    %c0_i32 = arith.constant 0 : i32
    %c0_i32_0 = arith.constant 0 : i32
    %c0_i32_1 = arith.constant 0 : i32
    %c0_i32_2 = arith.constant 0 : i32
    return %c0_i32, %c0_i32_0, %c0_i32_1 : i32, i32, i32
  }
  func.func @transform_7(%arg0: i32, %arg1: i32) -> (i32, i32, i32) {
    %c0_i32 = arith.constant 0 : i32
    %c0_i32_0 = arith.constant 0 : i32
    %c0_i32_1 = arith.constant 0 : i32
    %c0_i32_2 = arith.constant 0 : i32
    return %c0_i32, %c0_i32_0, %c0_i32_1 : i32, i32, i32
  }
  func.func @transform_8(%arg0: i32, %arg1: i32) -> (i32, i32, i32) {
    %c0_i32 = arith.constant 0 : i32
    %c0_i32_0 = arith.constant 0 : i32
    %c0_i32_1 = arith.constant 0 : i32
    %c0_i32_2 = arith.constant 0 : i32
    return %c0_i32, %c0_i32_0, %c0_i32_1 : i32, i32, i32
  }
  func.func @transform_9(%arg0: i32, %arg1: i32) -> (i32, i32) {
    %c0_i32 = arith.constant 0 : i32
    %c0_i32_0 = arith.constant 0 : i32
    %c0_i32_1 = arith.constant 0 : i32
    return %c0_i32, %c0_i32_0 : i32, i32
  }
  func.func @transform_10(%arg0: i32, %arg1: i32) -> (i32, i32) {
    %c0_i32 = arith.constant 0 : i32
    %c0_i32_0 = arith.constant 0 : i32
    %c0_i32_1 = arith.constant 0 : i32
    return %c0_i32, %c0_i32_0 : i32, i32
  }
  func.func @transform_11(%arg0: i32, %arg1: i32) -> (i32, i32) {
    %c0_i32 = arith.constant 0 : i32
    %c0_i32_0 = arith.constant 0 : i32
    %c0_i32_1 = arith.constant 0 : i32
    return %c0_i32, %c0_i32_0 : i32, i32
  }
  func.func @transform_12(%arg0: i32, %arg1: i32) -> (i32, i32, i32) {
    %c0_i32 = arith.constant 0 : i32
    %c0_i32_0 = arith.constant 0 : i32
    return %arg0, %arg1, %c0_i32 : i32, i32, i32
  }
}

</mosaic_0001>

<bundles_post_ra>
// kernel: tpu_custom_call.1
= control target key start
LH: loop header
LB: loop body
LE: loop exit
PB: predicated region body
PF: predicated region fallthrough
CT: control target
= control target key end

     0   :  { %s2964_s0 = inlined_call_operand.vmem [shape: f32[2,8,32], index: 0, kind: input, shape index: {}]   ;;  %s2965_s1 = inlined_call_operand.vmem [shape: f32[2,1,1,8], index: 1, kind: input, shape index: {}]   ;;  %s2966_s2 = inlined_call_operand.vmem [shape: bf16[4,32,8], index: 2, kind: input, shape index: {}]   ;;  %s2967_s3 = inlined_call_operand.vmem [shape: f32[4,1,8], index: 3, kind: input, shape index: {}]   ;;  %s2968_s4 = inlined_call_operand.vmem [shape: bf16[4,32,8], index: 4, kind: input, shape index: {}]   ;;  %s2969_s5 = inlined_call_operand.vmem [shape: f32[4,1,8], index: 5, kind: input, shape index: {}]   ;;  %s2970_s6 = inlined_call_operand.vmem [shape: bf16[4,32,8], index: 6, kind: input, shape index: {}]   ;;  %s2971_s7 = inlined_call_operand.vmem [shape: f32[4,1,8], index: 7, kind: input, shape index: {}]   ;;  %s2972_s8 = inlined_call_operand.vmem [shape: bf16[4,8,32], index: 8, kind: input, shape index: {}]   ;;  %s2973_s9 = inlined_call_operand.vmem [shape: f32[1,32], index: 9, kind: input, shape index: {}]   ;;  %s2974_s10 = inlined_call_operand.vmem [shape: f32[1,32], index: 10, kind: input, shape index: {}]   ;;  %s2975_s11 = inlined_call_operand.vmem [shape: f32[1,32], index: 11, kind: input, shape index: {}]   ;;  %s2976_s12 = inlined_call_operand.hbm [shape: f32[2,8,32], index: 12, kind: output, shape index: {}]  }
   0x1   :  { %2978 = sst [smem:[#allocation6_spill]] %s2964_s0 }
   0x2   :  { %2979 = sst [smem:[#allocation7_spill]] %s2965_s1 }
   0x3   :  { %2980 = sst [smem:[#allocation8_spill]] %s2966_s2 }
   0x4   :  { %17 = vsyncpa [#allocation3], 0 }
   0x5   :  { %19 = vsyncpa [#allocation3 + $0x1], 0  ;;  %s2552_s21 = smov 0   ;;  %s2554_s22 = smov 0  }
   0x6   :  { %s2556_s23 = smov 0   ;;  %s2558_s24 = smov 0  }
   0x7   :  { %s2560_s25 = smov 0   ;;  %s2562_s26 = smov 0  }
   0x8 LB: > { %s1999_s27 = sadd.s32 4294967295, %s2481_s26   ;;  %s2000_s28 = sadd.s32 4294967294, %s2481_s26   ;;  %s2481_s26 = sphi %s2562_s26, %s25_s26   ;;  %s2477_s25 = sphi %s2560_s25, %s2992_s25   ;;  %s2473_s24 = sphi %s2558_s24, %s2991_s24   ;;  %s2469_s23 = sphi %s2556_s23, %s2990_s23   ;;  %s2465_s22 = sphi %s2554_s22, %s2989_s22   ;;  %s2461_s21 = sphi %s2552_s21, %s2988_s21  }
   0x9   : > { %s37_s29 = sadd.s32 1, %s2477_s25  ;;  %s310_s30 = sadd.s32 1, %s2469_s23 }
   0xa   : > { %p39_p0 = scmp.ge.s32.totalorder %s37_s29, 2  ;;  %p320_p1 = scmp.ne.s32.totalorder %s2469_s23, %s2465_s22 }
   0xb   : > { %p321_p2 = scmp.eq.s32.totalorder %s1999_s27, 1  ;;  %p326_p3 = scmp.ne.s32.totalorder %s2465_s22, %s2461_s21 }
   0xc   : > { %s2994_s29 = smov (%p39_p0, %s37_s29), 0  ;;  %p327_p5 = scmp.eq.s32.totalorder %s2000_s28, 1 }
   0xd   : > { %2981 = sst [smem:[#allocation5_spill]] %s2994_s29  ;;  %p2592_p4 = por %p321_p2, %p320_p1 }
   0xe   : > { %s305_s14 = ssub.s32 %s2477_s25, %s2994_s29  ;;  %p2003_p6 = scmp.ge.s32.totalorder %s2481_s26, 1 }
   0xf   : > { %p308_p7 = scmp.eq.s32.totalorder %s305_s14, 0  ;;  %p2599_p8 = por %p327_p5, %p326_p3 }
  0x10   : > { %p391_p9 = scmp.lt.s32.totalorder %s2481_s26, 3 }
  0x11   : > { %s2605_s16 = scalar_select %p308_p7, %s2469_s23, %s310_s30  }
  0x12   : > { %p392_p10 = pnand %p2003_p6, %p391_p9 }
  0x13   : > { %s2984_s2 = sld [smem:[#allocation8_spill]] (!%p392_p10)  ;;  %v2483_v1 = vmov (!%p392_p10), 0.0   ;;  %vm2484_vm0 = vmmov (!%p392_p10), 0   ;;  %p438_p11 = scmp.lt.s32.totalorder (!%p392_p10), %s2473_s24, 1  ;;  %vm507_vm1 = vcmask (!%p392_p10), 261120   ;;  %v2367_v11 = vld [vmem:[%s2968_s4] sm:$0xff] (!%p392_p10)  }
  0x14   : > { %395 = sbr.rel (%p392_p10) target bundleno = 1590 (0x636), region = 68  ;;  %2133 = vmatprep.subr.bf16.mxu0 (!%p392_p10), %v2483_v1  ;;  %2141 = vmatprep.subr.bf16.mxu1 (!%p392_p10), %v2483_v1  ;;  %s2985_s0 = sld [smem:[#allocation6_spill]] (!%p392_p10)  ;;  %v2368_v12 = vld [vmem:[%s2968_s4 + $0x10] sm:$0xff] (!%p392_p10)   ;;  %v2369_v13 = vld [vmem:[%s2968_s4 + $0x8] sm:$0xff] (!%p392_p10)   ;;  %v2370_v14 = vld [vmem:[%s2968_s4 + $0x18] sm:$0xff] (!%p392_p10)   ;;  %vm1219_vm2 = vcmask (!%p392_p10), 64512  }
  0x15   : > { %2137 = vmatprep.mubr.msk.bf16.mxu0 (!%p392_p10), %vm2484_vm0, %v2483_v1  ;;  %2145 = vmatprep.mubr.msk.bf16.mxu1 (!%p392_p10), %vm2484_vm0, %v2483_v1  ;;  %v2371_v15 = vld [vmem:[%s2968_s4 + $0x20] sm:$0xff] (!%p392_p10)   ;;  %v2372_v16 = vld [vmem:[%s2968_s4 + $0x30] sm:$0xff] (!%p392_p10)   ;;  %v2373_v17 = vld [vmem:[%s2968_s4 + $0x28] sm:$0xff] (!%p392_p10)   ;;  %vm1475_vm3 = vcmask (!%p392_p10), 1043456   ;;  %s2986_s1 = sld [smem:[#allocation7_spill]] (!%p392_p10)  ;;  %s435_s14 = sand.u32 (!%p392_p10), 1, %s2465_s22  }
  0x16   : > { %v2374_v18 = vld [vmem:[%s2968_s4 + $0x38] sm:$0xff] (!%p392_p10)   ;;  %v2375_v19 = vld [vmem:[%s2970_s6] sm:$0xff] (!%p392_p10)   ;;  %v2376_v20 = vld [vmem:[%s2970_s6 + $0x10] sm:$0xff] (!%p392_p10)   ;;  %s2070_s27 = sshll.u32 (!%p392_p10), %s2473_s24, 7  ;;  %s1905_s19 = scalar_lea.sflag (!%p392_p10), [#allocation3], %s435_s14 }
  0x17   : > { %v2377_v21 = vld [vmem:[%s2970_s6 + $0x8] sm:$0xff] (!%p392_p10)   ;;  %v2378_v22 = vld [vmem:[%s2970_s6 + $0x18] sm:$0xff] (!%p392_p10)   ;;  %v2379_v23 = vld [vmem:[%s2970_s6 + $0x20] sm:$0xff] (!%p392_p10)  }
  0x18   : > { %v2380_v24 = vld [vmem:[%s2970_s6 + $0x30] sm:$0xff] (!%p392_p10)   ;;  %v2381_v25 = vld [vmem:[%s2970_s6 + $0x28] sm:$0xff] (!%p392_p10)   ;;  %v2382_v26 = vld [vmem:[%s2970_s6 + $0x38] sm:$0xff] (!%p392_p10)  }
  0x19   : > { %v2359_v0 = vld [vmem:[%s2984_s2] sm:$0xff] (!%p392_p10)   ;;  %v2360_v2 = vld [vmem:[%s2984_s2 + $0x10] sm:$0xff] (!%p392_p10)   ;;  %v2361_v3 = vld [vmem:[%s2984_s2 + $0x8] sm:$0xff] (!%p392_p10)  }
  0x1a   : > { %2134 = vmatpush3.bf16.msra.mxu0 (!%p392_p10), %v2359_v0  ;;  %2142 = vmatpush3.bf16.msra.mxu1 (!%p392_p10), %v2360_v2  ;;  %v2362_v4 = vld [vmem:[%s2984_s2 + $0x18] sm:$0xff] (!%p392_p10)   ;;  %v2363_v5 = vld [vmem:[%s2984_s2 + $0x20] sm:$0xff] (!%p392_p10)   ;;  %v2364_v6 = vld [vmem:[%s2984_s2 + $0x30] sm:$0xff] (!%p392_p10)  }
  0x1b   : > { %2135 = vmatprep.subr.bf16.mxu0 %v2483_v1  ;;  %2143 = vmatprep.subr.bf16.mxu1 %v2483_v1  ;;  %s2629_s17 = scalar_select %p438_p11, %s2473_s24, 1  ;;  %v2365_v9 = vld [vmem:[%s2984_s2 + $0x28] sm:$0xff]   ;;  %v2366_v10 = vld [vmem:[%s2984_s2 + $0x38] sm:$0xff]   ;;  %v2022_v43 = vld [vmem:[%s2969_s5] ss:$0 sm:$0xff] }
  0x1c   : > { %v2023_v44 = vld [vmem:[%s2969_s5 + $0x1] ss:$0 sm:$0xff]  ;;  %v2006_v57 = vld [vmem:[%s2967_s3] ss:$0 sm:$0xff]  ;;  %v2024_v61 = vld [vmem:[%s2969_s5 + $0x2] ss:$0 sm:$0xff]  ;;  %s2916_s2 = scalar_lea.hbm %s2976_s12, %s2070_s27 }
  0x1d   : > { %s2005_s18 = sshll.u32 %s2629_s17, 3  ;;  %v2007_v58 = vld [vmem:[%s2967_s3 + $0x1] ss:$0 sm:$0xff]  ;;  %v2025_v62 = vld [vmem:[%s2969_s5 + $0x3] ss:$0 sm:$0xff]  ;;  %s447_s29 = scalar_lea.vmem %s2986_s1, %s2629_s17 }
  0x1e   : > { %2136 = vmatpush3.bf16.msra.mxu0 %v2361_v3  ;;  %2144 = vmatpush3.bf16.msra.mxu1 %v2362_v4  ;;  %s444_s30 = scalar_lea.vmem %s2985_s0, %s2005_s18  ;;  %s2004_s18 = sshll.u32 %s435_s14, 3 }
  0x1f   : > { %2149 = vmatprep.subr.bf16.mxu0 %v2483_v1  ;;  %v2642_v7 = vld [vmem:[%s444_s30] sm:$0xff]  ;;  %2157 = vmatprep.subr.bf16.mxu1 %v2483_v1  ;;  %s437_s28 = scalar_lea.vmem [#allocation2], %s2004_s18  ;;  %s2486_s24 = smov [#allocation2]  }
  0x20   : > { %v2647_v8 = vpack.c.bf16 %v2642_v7, %v2642_v7  ;;  %s1919_s30 = sshll.u32 %s437_s28, 4  ;;  %s2407_s18 = sshll.u32 %s2486_s24, 4  ;;  %s2918_s30 = int_to_ptr.vmem [resolvable:$true] %s1919_s30  ;;  %s2408_s18 = int_to_ptr.vmem [resolvable:$false] %s2407_s18 }
  0x21   : > { %s2409_s17 = scalar_lea.vmem %s2408_s18, 256  ;;  %p2410_p1 = scmp.lt.s32.totalorder %s2918_s30, %s2408_s18 }
  0x22   : > { %2138 = vmatmul.mubr.msk.bf16.vlgmr.msra.gmra.mrb[0].mxu0 %vm507_vm1, %v2647_v8  ;;  %2146 = vmatmul.mubr.msk.bf16.vlgmr.msra.gmra.mrb[0].mxu1 %vm507_vm1, %v2647_v8 }
  0x23   : > { %2150 = vmatpush3.bf16.msra.mxu0 %v2363_v5  ;;  %2158 = vmatpush3.bf16.msra.mxu1 %v2364_v6 }
  0x24   : > { %2151 = vmatprep.subr.bf16.mxu0 %v2483_v1  ;;  %2159 = vmatprep.subr.bf16.mxu1 %v2483_v1 }
  0x25   : > { %2153 = vmatprep.mubr.msk.bf16.mxu0 %vm2484_vm0, %v2483_v1  ;;  %2161 = vmatprep.mubr.msk.bf16.mxu1 %vm2484_vm0, %v2483_v1 }
  0x27   : > { %2152 = vmatpush3.bf16.msra.mxu0 %v2365_v9  ;;  %2160 = vmatpush3.bf16.msra.mxu1 %v2366_v10 }
  0x28   : > { %2165 = vmatprep.subr.bf16.mxu0 %v2483_v1  ;;  %2173 = vmatprep.subr.bf16.mxu1 %v2483_v1 }
  0x2a   : > { %2154 = vmatmul.mubr.msk.bf16.vlgmr.msra.gmra.mrb[4].mxu0 %vm507_vm1, %v2647_v8  ;;  %2162 = vmatmul.mubr.msk.bf16.vlgmr.msra.gmra.mrb[4].mxu1 %vm507_vm1, %v2647_v8 }
  0x2b   : > { %2166 = vmatpush3.bf16.msra.mxu0 %v2367_v11  ;;  %2174 = vmatpush3.bf16.msra.mxu1 %v2368_v12 }
  0x2c   : > { %2167 = vmatprep.subr.bf16.mxu0 %v2483_v1  ;;  %2175 = vmatprep.subr.bf16.mxu1 %v2483_v1 }
  0x2d   : > { %2169 = vmatprep.mubr.msk.bf16.mxu0 %vm2484_vm0, %v2483_v1  ;;  %2177 = vmatprep.mubr.msk.bf16.mxu1 %vm2484_vm0, %v2483_v1 }
  0x2f   : > { %2168 = vmatpush3.bf16.msra.mxu0 %v2369_v13  ;;  %2176 = vmatpush3.bf16.msra.mxu1 %v2370_v14 }
  0x30   : > { %2181 = vmatprep.subr.bf16.mxu0 %v2483_v1  ;;  %2189 = vmatprep.subr.bf16.mxu1 %v2483_v1 }
  0x32   : > { %2170 = vmatmul.mubr.msk.bf16.vlgmr.msra.gmra.mrb[8].mxu0 %vm507_vm1, %v2647_v8  ;;  %2178 = vmatmul.mubr.msk.bf16.vlgmr.msra.gmra.mrb[8].mxu1 %vm507_vm1, %v2647_v8 }
  0x33   : > { %2182 = vmatpush3.bf16.msra.mxu0 %v2371_v15  ;;  %2190 = vmatpush3.bf16.msra.mxu1 %v2372_v16 }
  0x34   : > { %2183 = vmatprep.subr.bf16.mxu0 %v2483_v1  ;;  %2191 = vmatprep.subr.bf16.mxu1 %v2483_v1 }
  0x35   : > { %2185 = vmatprep.mubr.msk.bf16.mxu0 %vm2484_vm0, %v2483_v1  ;;  %2193 = vmatprep.mubr.msk.bf16.mxu1 %vm2484_vm0, %v2483_v1 }
  0x37   : > { %2184 = vmatpush3.bf16.msra.mxu0 %v2373_v17  ;;  %2192 = vmatpush3.bf16.msra.mxu1 %v2374_v18  ;;  %v2008_v17 = vld [vmem:[%s2967_s3 + $0x2] ss:$0 sm:$0xff]  ;;  %v2009_v18 = vld [vmem:[%s2967_s3 + $0x3] ss:$0 sm:$0xff] }
  0x38   : > { %2197 = vmatprep.subr.bf16.mxu0 %v2483_v1  ;;  %2205 = vmatprep.subr.bf16.mxu1 %v2483_v1 }
  0x3a   : > { %2186 = vmatmul.mubr.msk.bf16.vlgmr.msra.gmra.mrb[12].mxu0 %vm507_vm1, %v2647_v8  ;;  %2194 = vmatmul.mubr.msk.bf16.vlgmr.msra.gmra.mrb[12].mxu1 %vm507_vm1, %v2647_v8 }
  0x3b   : > { %2198 = vmatpush3.bf16.msra.mxu0 %v2375_v19  ;;  %2201 = vmatprep.mubr.msk.bf16.mxu0 %vm2484_vm0, %v2483_v1 }
  0x3c   : > { %2199 = vmatprep.subr.bf16.mxu0 %v2483_v1  ;;  %2209 = vmatprep.mubr.msk.bf16.mxu1 %vm2484_vm0, %v2483_v1 }
  0x3d   : > { %2206 = vmatpush3.bf16.msra.mxu1 %v2376_v20 }
  0x3e   : > { %2207 = vmatprep.subr.bf16.mxu1 %v2483_v1 }
  0x3f   : > { %2200 = vmatpush3.bf16.msra.mxu0 %v2377_v21 }
  0x40   : > { %2213 = vmatprep.subr.bf16.mxu0 %v2483_v1 }
  0x41   : > { %2208 = vmatpush3.bf16.msra.mxu1 %v2378_v22 }
  0x42   : > { %2202 = vmatmul.mubr.msk.bf16.vlgmr.msra.gmra.mrb[16].mxu0 %vm507_vm1, %v2647_v8  ;;  %2221 = vmatprep.subr.bf16.mxu1 %v2483_v1 }
  0x43   : > { %2217 = vmatprep.mubr.msk.bf16.mxu0 %vm2484_vm0, %v2483_v1  ;;  %2214 = vmatpush3.bf16.msra.mxu0 %v2379_v23 }
  0x44   : > { %2210 = vmatmul.mubr.msk.bf16.vlgmr.msra.gmra.mrb[16].mxu1 %vm507_vm1, %v2647_v8  ;;  %2215 = vmatprep.subr.bf16.mxu0 %v2483_v1 }
  0x45   : > { %2222 = vmatpush3.bf16.msra.mxu1 %v2380_v24  ;;  %2225 = vmatprep.mubr.msk.bf16.mxu1 %vm2484_vm0, %v2483_v1 }
  0x46   : > { %2223 = vmatprep.subr.bf16.mxu1 %v2483_v1 }
  0x47   : > { %2216 = vmatpush3.bf16.msra.mxu0 %v2381_v25  ;;  %v2038_v25 = vld [vmem:[%s2971_s7] ss:$0 sm:$0xff] }
  0x48   : > { %2229 = vmatprep.subr.bf16.mxu0 %v2483_v1 }
  0x49   : > { %2224 = vmatpush3.bf16.msra.mxu1 %v2382_v26 }
  0x4a   : > { %2235 = vmatprep.subr.bf16.mxu1 %v2483_v1  ;;  %2218 = vmatmul.mubr.msk.bf16.vlgmr.msra.gmra.mrb[20].mxu0 %vm507_vm1, %v2647_v8 }
  0x4b   : > { %2231 = vmatprep.mubr.msk.bf16.mxu0 %vm2484_vm0, %v2483_v1 }
  0x4c   : > { %2226 = vmatmul.mubr.msk.bf16.vlgmr.msra.gmra.mrb[20].mxu1 %vm507_vm1, %v2647_v8 }
  0x4d   : > { %2237 = vmatprep.mubr.msk.bf16.mxu1 %vm2484_vm0, %v2483_v1 }
  0xf5   : > { %v545_v27 = vpop.f32.mrb[0].mxu0  ;;  %v597_v28 = vpop.f32.mrb[0].mxu1 }
  0xf6   : > { %v2139_v29 = vpop.f32.mrb[1].mxu0  ;;  %v2147_v30 = vpop.f32.mrb[1].mxu1  ;;  %v546_v63 = vadd.f32 %v2006_v57, %v545_v27  ;;  %v598_v0 = vadd.f32 %v2007_v58, %v597_v28  ;;  %v2039_v27 = vld [vmem:[%s2971_s7 + $0x1] ss:$0 sm:$0xff] }
  0xf7   : > { %v548_v31 = vpop.f32.mrb[2].mxu0  ;;  %v600_v32 = vpop.f32.mrb[2].mxu1 }
  0xf8   : > { %v2140_v33 = vpop.f32.mrb[3].mxu0  ;;  %v2148_v34 = vpop.f32.mrb[3].mxu1  ;;  %v1211_v11 = vpack.c.bf16 %v546_v63, %v546_v63  ;;  %v1212_v12 = vpack.c.bf16 %v598_v0, %v598_v0 }
  0xfd   : > { %v649_v35 = vpop.f32.mrb[4].mxu0  ;;  %v701_v36 = vpop.f32.mrb[4].mxu1 }
  0xfe   : > { %v2155_v37 = vpop.f32.mrb[5].mxu0  ;;  %v2163_v38 = vpop.f32.mrb[5].mxu1  ;;  %v650_v21 = vadd.f32 %v2008_v17, %v649_v35  ;;  %v702_v22 = vadd.f32 %v2009_v18, %v701_v36 }
  0xff   : > { %v652_v39 = vpop.f32.mrb[6].mxu0  ;;  %v704_v40 = vpop.f32.mrb[6].mxu1 }
 0x100   : > { %v2156_v41 = vpop.f32.mrb[7].mxu0  ;;  %v2164_v42 = vpop.f32.mrb[7].mxu1  ;;  %v1213_v23 = vpack.c.bf16 %v650_v21, %v650_v21  ;;  %v1214_v24 = vpack.c.bf16 %v702_v22, %v702_v22 }
 0x105   : > { %v797_v45 = vpop.f32.mrb[8].mxu0  ;;  %v849_v46 = vpop.f32.mrb[8].mxu1 }
 0x106   : > { %v798_v47 = vadd.f32 %v2022_v43, %v797_v45  ;;  %v850_v48 = vadd.f32 %v2023_v44, %v849_v46  ;;  %v2171_v49 = vpop.f32.mrb[9].mxu0  ;;  %v2179_v50 = vpop.f32.mrb[9].mxu1 }
 0x107   : > { %v800_v51 = vpop.f32.mrb[10].mxu0  ;;  %v852_v52 = vpop.f32.mrb[10].mxu1  ;;  %v1411_v49 = vlaneseq  ;;  %v1408_v50 = vld [vmem:[%s447_s29] sm:$0x1]  ;;  %s2403_s29 = scalar_lea.vmem %s2918_s30, 128 }
 0x108   : > { %v1215_v53 = vpack.c.bf16 %v798_v47, %v798_v47  ;;  %v1216_v54 = vpack.c.bf16 %v850_v48, %v850_v48  ;;  %v2172_v55 = vpop.f32.mrb[11].mxu0  ;;  %v2180_v56 = vpop.f32.mrb[11].mxu1  ;;  %vm1409_vm4 = vcmp.eq.f32.partialorder %v1408_v50, 0.0  ;;  %p2404_p12 = scmp.ne.s32.totalorder %s2918_s30, %s2403_s29  ;;  %p2411_p2 = scmp.lt.s32.totalorder %s2409_s17, %s2403_s29 }
 0x109   : > { %v1412_v51 = vshrl.u32 %v1411_v49, 7  ;;  %v2041_v49 = vld [vmem:[%s2971_s7 + $0x3] ss:$0 sm:$0xff] }
 0x10a   : > { %v1224_v59 = vsel %vm1219_vm2, %v1215_v53, 0  ;;  %v1270_v60 = vsel %vm1219_vm2, %v1216_v54, 0  ;;  %v2485_v53 = vmov 0   ;;  %p2405_p13 = pnand %p2404_p12, %p2592_p4  ;;  %p2412_p3 = por %p2411_p2, %p2410_p1 }
 0x10b   : > { %2230 = vmatpush3.bf16.xpose.msra.mxu0 %v1224_v59  ;;  %2236 = vmatpush3.bf16.xpose.msra.mxu1 %v1270_v60  ;;  %v1413_v52 = vsub.s32 0, %v1412_v51  ;;  %v1410_v54 = vsel %vm1409_vm4, 1, %v2485_v53 }
 0x10c   : > { %2241 = vmatprep.subr.bf16.mxu0 %v2483_v1  ;;  %2247 = vmatprep.subr.bf16.mxu1 %v2483_v1  ;;  %p2406_p0 = pneg %p2405_p13 }
 0x10d   : > { %v901_v2 = vpop.f32.mrb[12].mxu0  ;;  %v953_v3 = vpop.f32.mrb[12].mxu1  ;;  %v1414_v55 = vrot.slane %v1410_v54, %v1413_v52 }
 0x10e   : > { %v902_v4 = vadd.f32 %v2024_v61, %v901_v2  ;;  %v954_v5 = vadd.f32 %v2025_v62, %v953_v3  ;;  %v2187_v6 = vpop.f32.mrb[13].mxu0  ;;  %v2195_v8 = vpop.f32.mrb[13].mxu1  ;;  %p2413_p5 = pnand %p2412_p3, %p2406_p0 }
 0x10f   : > { %v904_v9 = vpop.f32.mrb[14].mxu0  ;;  %v956_v10 = vpop.f32.mrb[14].mxu1  ;;  %vm1415_vm5 = vcmp.eq.s32.totalorder %v1414_v55, 1 }
 0x110   : > { %v1217_v13 = vpack.c.bf16 %v902_v4, %v902_v4  ;;  %v1218_v14 = vpack.c.bf16 %v954_v5, %v954_v5  ;;  %v2188_v15 = vpop.f32.mrb[15].mxu0  ;;  %v2196_v16 = vpop.f32.mrb[15].mxu1 }
 0x112   : > { %v1316_v19 = vsel %vm1219_vm2, %v1217_v13, 0  ;;  %v1362_v20 = vsel %vm1219_vm2, %v1218_v14, 0  ;;  %2232 = vmatmul.mubr.msk.bf16.vlgmr.msra.gmra.mrb[24].mxu0 %vm1219_vm2, %v1211_v11  ;;  %2238 = vmatmul.mubr.msk.bf16.vlgmr.msra.gmra.mrb[24].mxu1 %vm1219_vm2, %v1212_v12 }
 0x113   : > { %2242 = vmatpush3.bf16.xpose.msra.mxu0 %v1316_v19  ;;  %2248 = vmatpush3.bf16.xpose.msra.mxu1 %v1362_v20 }
 0x114   : > { %2243 = vmatprep.mubr.msk.bf16.mxu0 %vm2484_vm0, %v2483_v1  ;;  %2249 = vmatprep.mubr.msk.bf16.mxu1 %vm2484_vm0, %v2483_v1 }
 0x115   : > { %2253 = vmatprep.subr.bf16.mxu0 %v2483_v1  ;;  %2259 = vmatprep.subr.bf16.mxu1 %v2483_v1  ;;  %v1049_v26 = vpop.f32.mrb[16].mxu0 }
 0x116   : > { %v1050_v28 = vadd.f32 %v2038_v25, %v1049_v26  ;;  %v2203_v29 = vpop.f32.mrb[17].mxu0 }
 0x117   : > { %v1052_v30 = vpop.f32.mrb[18].mxu0  ;;  %v1101_v31 = vpop.f32.mrb[16].mxu1 }
 0x118   : > { %v1468_v32 = vpack.c.bf16 %v1050_v28, %v1050_v28  ;;  %v2204_v33 = vpop.f32.mrb[19].mxu0  ;;  %v1102_v34 = vadd.f32 %v2039_v27, %v1101_v31  ;;  %v2211_v35 = vpop.f32.mrb[17].mxu1 }
 0x119   : > { %v1104_v36 = vpop.f32.mrb[18].mxu1 }
 0x11a   : > { %2244 = vmatmul.mubr.msk.bf16.vlgmr.msra.gmra.mrb[28].mxu0 %vm1219_vm2, %v1213_v23  ;;  %2250 = vmatmul.mubr.msk.bf16.vlgmr.msra.gmra.mrb[28].mxu1 %vm1219_vm2, %v1214_v24  ;;  %v1477_v37 = vsel %vm1475_vm3, %v1468_v32, 0  ;;  %v1469_v38 = vpack.c.bf16 %v1102_v34, %v1102_v34  ;;  %v2212_v39 = vpop.f32.mrb[19].mxu1 }
 0x11b   : > { %2255 = vmatprep.mubr.msk.bf16.mxu0 %vm2484_vm0, %v2483_v1  ;;  %2261 = vmatprep.mubr.msk.bf16.mxu1 %vm2484_vm0, %v2483_v1 }
 0x11c   : > { %2254 = vmatpush3.bf16.msra.mxu0 %v1477_v37  ;;  %v1523_v40 = vsel %vm1475_vm3, %v1469_v38, 0 }
 0x11d   : > { %2265 = vmatprep.subr.bf16.mxu0 %v2483_v1  ;;  %2260 = vmatpush3.bf16.msra.mxu1 %v1523_v40  ;;  %v2825_v41 = vpop.f32.mrb[20].mxu0 }
 0x11e   : > { %2271 = vmatprep.subr.bf16.mxu1 %v2483_v1  ;;  %v2219_v43 = vpop.f32.mrb[21].mxu0 }
 0x11f   : > { %v2827_v42 = vpop.f32.mrb[20].mxu1  ;;  %v1156_v45 = vpop.f32.mrb[22].mxu0 }
 0x120   : > { %v2227_v44 = vpop.f32.mrb[21].mxu1  ;;  %v2220_v47 = vpop.f32.mrb[23].mxu0  ;;  %v1206_v52 = vadd.f32 %v2041_v49, %v2827_v42  ;;  %v1661_v42 = vld [vmem:[%s2972_s8] sm:$0xf] }
 0x121   : > { %v1208_v46 = vpop.f32.mrb[22].mxu1 }
 0x122   : > { %v2228_v48 = vpop.f32.mrb[23].mxu1  ;;  %v2040_v46 = vld [vmem:[%s2971_s7 + $0x2] ss:$0 sm:$0xff] }
 0x123   : > { %v1154_v47 = vadd.f32 %v2040_v46, %v2825_v41 }
 0x125   : > { %v1470_v51 = vpack.c.bf16 %v1154_v47, %v1154_v47 }
 0x1e5   : > { %v1260_v56 = vpop.f32.mrb[24].mxu0  ;;  %v1306_v57 = vpop.f32.mrb[24].mxu1 }
 0x1e6   : > { %v1404_v58 = vmul.f32 0.35355338, %v1260_v56  ;;  %v1405_v59 = vmul.f32 0.35355338, %v1306_v57  ;;  %v2233_v60 = vpop.f32.mrb[25].mxu0  ;;  %v2239_v61 = vpop.f32.mrb[25].mxu1 }
 0x1e7   : > { %v1263_v62 = vpop.f32.mrb[26].mxu0  ;;  %v1309_v63 = vpop.f32.mrb[26].mxu1  ;;  %v1569_v57 = vsel %vm1475_vm3, %v1470_v51, 0 }
 0x1e8   : > { %v2234_v0 = vpop.f32.mrb[27].mxu0  ;;  %v2240_v2 = vpop.f32.mrb[27].mxu1  ;;  %v1416_v3 = vsel %vm1415_vm5, -1e+09, %v1404_v58  ;;  %v1417_v5 = vsel %vm1415_vm5, -1e+09, %v1405_v59  ;;  %v1471_v58 = vpack.c.bf16 %v1206_v52, %v1206_v52 }
 0x1e9   : > { %v1420_v4 = vsel %vm1219_vm2, %v1416_v3, -inf  ;;  %v1423_v9 = vsel %vm1219_vm2, %v1417_v5, -inf  ;;  %v1669_v0 = vsel %vm1475_vm3, %v1661_v42, 0  ;;  %v2066_v52 = vld [vmem:[%s2973_s9] ss:$0 sm:$0xff] }
 0x1ea   : > { %1421 = vmax.xlane.f32.xlu0 %v1420_v4  ;;  %v1615_v61 = vsel %vm1475_vm3, %v1471_v58, 0 }
 0x1ed   : > { %v1352_v6 = vpop.f32.mrb[28].mxu0  ;;  %v1398_v8 = vpop.f32.mrb[28].mxu1 }
 0x1ee   : > { %v1406_v10 = vmul.f32 0.35355338, %v1352_v6  ;;  %v1407_v11 = vmul.f32 0.35355338, %v1398_v8  ;;  %v2251_v12 = vpop.f32.mrb[29].mxu1  ;;  %1424 = vmax.xlane.f32.xlu0 %v1423_v9  ;;  %v2245_v13 = vpop.f32.mrb[29].mxu0 }
 0x1ef   : > { %v1355_v14 = vpop.f32.mrb[30].mxu0  ;;  %v1401_v15 = vpop.f32.mrb[30].mxu1  ;;  %v1663_v8 = vld [vmem:[%s2972_s8 + $0x8] sm:$0xf] }
 0x1f0   : > { %v2246_v16 = vpop.f32.mrb[31].mxu0  ;;  %v2252_v17 = vpop.f32.mrb[31].mxu1  ;;  %v1418_v18 = vsel %vm1415_vm5, -1e+09, %v1406_v10  ;;  %v1419_v20 = vsel %vm1415_vm5, -1e+09, %v1407_v11 }
 0x1f1   : > { %v1426_v19 = vsel %vm1219_vm2, %v1418_v18, -inf  ;;  %v1429_v21 = vsel %vm1219_vm2, %v1419_v20, -inf  ;;  %v1761_v12 = vsel %vm1475_vm3, %v1663_v8, 0  ;;  %v1664_v14 = vld [vmem:[%s2972_s8 + $0xc] sm:$0xf] }
 0x1f2   : > { %1427 = vmax.xlane.f32.xlu1 %v1426_v19  ;;  %v1807_v19 = vsel %vm1475_vm3, %v1664_v14, 0  ;;  %v2067_v8 = vld [vmem:[%s2974_s10] ss:$0 sm:$0xff] }
 0x1f6   : > { %1430 = vmax.xlane.f32.xlu1 %v1429_v21 }
 0x277   : > { %v1422_v22 = vpop.xlane.xlu0 %1421 }
 0x278   : > { %v1432_v23 = vsub.f32 %v1416_v3, %v1422_v22 }
 0x27a   : > { %v1436_v24 = vmul.f32 1.442695, %v1432_v23 }
 0x27b   : > { %v1425_v25 = vpop.xlane.xlu0 %1424 }
 0x27c   : > { %2383 = vpow2.f32 %v1436_v24  ;;  %v1433_v26 = vsub.f32 %v1417_v5, %v1425_v25  ;;  %v1662_v5 = vld [vmem:[%s2972_s8 + $0x4] sm:$0xf] }
 0x27d   : > { %v1715_v6 = vsel %vm1475_vm3, %v1662_v5, 0 }
 0x27e   : > { %v1438_v27 = vmul.f32 1.442695, %v1433_v26 }
 0x27f   : > { %v1428_v28 = vpop.xlane.xlu1 %1427 }
 0x280   : > { %2385 = vpow2.f32 %v1438_v27  ;;  %v1434_v29 = vsub.f32 %v1418_v18, %v1428_v28 }
 0x282   : > { %v1440_v30 = vmul.f32 1.442695, %v1434_v29 }
 0x283   : > { %v1431_v31 = vpop.xlane.xlu1 %1430 }
 0x284   : > { %2387 = vpow2.f32 %v1440_v30  ;;  %v1435_v32 = vsub.f32 %v1419_v20, %v1431_v31 }
 0x286   : > { %v2384_v33 = vpop.eup %2383  ;;  %v1442_v34 = vmul.f32 1.442695, %v1435_v32 }
 0x287   : > { %v1444_v35 = vsel %vm1219_vm2, %v2384_v33, 0.0 }
 0x288   : > { %2389 = vpow2.f32 %v1442_v34  ;;  %1445 = vadd.xlane.f32.xlu0 %v1444_v35 }
 0x28a   : > { %v2386_v36 = vpop.eup %2385 }
 0x28b   : > { %v1447_v37 = vsel %vm1219_vm2, %v2386_v36, 0.0 }
 0x28c   : > { %1448 = vadd.xlane.f32.xlu1 %v1447_v37 }
 0x28e   : > { %v2388_v38 = vpop.eup %2387 }
 0x28f   : > { %v1450_v39 = vsel %vm1219_vm2, %v2388_v38, 0.0 }
 0x290   : > { %1451 = vadd.xlane.f32.xlu0 %v1450_v39 }
 0x292   : > { %v2390_v40 = vpop.eup %2389 }
 0x293   : > { %v1453_v43 = vsel %vm1219_vm2, %v2390_v40, 0.0 }
 0x294   : > { %1454 = vadd.xlane.f32.xlu1 %v1453_v43 }
 0x315   : > { %v1446_v44 = vpop.xlane.xlu0 %1445 }
 0x316   : > { %2391 = vrcp.f32 %v1446_v44 }
 0x319   : > { %v1449_v45 = vpop.xlane.xlu1 %1448 }
 0x31a   : > { %2393 = vrcp.f32 %v1449_v45 }
 0x31d   : > { %v1452_v48 = vpop.xlane.xlu0 %1451 }
 0x31e   : > { %2395 = vrcp.f32 %v1452_v48 }
 0x320   : > { %v2392_v50 = vpop.eup %2391 }
 0x321   : > { %v1460_v53 = vmul.f32 %v2392_v50, %v2384_v33  ;;  %v1455_v54 = vpop.xlane.xlu1 %1454 }
 0x322   : > { %2397 = vrcp.f32 %v1455_v54 }
 0x323   : > { %v1464_v55 = vpack.c.bf16 %v1460_v53, %v1460_v53 }
 0x324   : > { %v2394_v56 = vpop.eup %2393 }
 0x325   : > { %v1461_v59 = vmul.f32 %v2394_v56, %v2386_v36  ;;  %2256 = vmatmul.mubr.msk.bf16.vlgmr.msra.gmra.mrb[32].mxu0 %vm1219_vm2, %v1464_v55 }
 0x326   : > { %2266 = vmatpush3.bf16.msra.mxu0 %v1569_v57  ;;  %2267 = vmatprep.mubr.msk.bf16.mxu0 %vm2484_vm0, %v2483_v1 }
 0x327   : > { %v1465_v41 = vpack.c.bf16 %v1461_v59, %v1461_v59  ;;  %2277 = vmatprep.subr.bf16.mxu0 %v2483_v1 }
 0x328   : > { %v2396_v60 = vpop.eup %2395 }
 0x329   : > { %v1462_v62 = vmul.f32 %v2396_v60, %v2388_v38  ;;  %2262 = vmatmul.mubr.msk.bf16.vlgmr.msra.gmra.mrb[32].mxu1 %vm1219_vm2, %v1465_v41 }
 0x32a   : > { %2272 = vmatpush3.bf16.msra.mxu1 %v1615_v61  ;;  %2273 = vmatprep.mubr.msk.bf16.mxu1 %vm2484_vm0, %v2483_v1 }
 0x32b   : > { %v1466_v63 = vpack.c.bf16 %v1462_v62, %v1462_v62  ;;  %2283 = vmatprep.subr.bf16.mxu1 %v2483_v1 }
 0x32c   : > { %v2398_v2 = vpop.eup %2397 }
 0x32d   : > { %v1463_v3 = vmul.f32 %v2398_v2, %v2390_v40  ;;  %2268 = vmatmul.mubr.msk.bf16.vlgmr.msra.gmra.mrb[36].mxu0 %vm1219_vm2, %v1466_v63 }
 0x32e   : > { %2278 = vmatpush3.bf16.msra.mxu0 %v1669_v0  ;;  %2279 = vmatprep.mubr.msk.bf16.mxu0 %vm2484_vm0, %v2483_v1 }
 0x32f   : > { %v1467_v4 = vpack.c.bf16 %v1463_v3, %v1463_v3  ;;  %2289 = vmatprep.subr.bf16.mxu0 %v2483_v1 }
 0x331   : > { %2274 = vmatmul.mubr.msk.bf16.vlgmr.msra.gmra.mrb[36].mxu1 %vm1219_vm2, %v1467_v4 }
 0x332   : > { %2285 = vmatprep.mubr.msk.bf16.mxu1 %vm2484_vm0, %v2483_v1  ;;  %2284 = vmatpush3.bf16.msra.mxu1 %v1715_v6 }
 0x333   : > { %2295 = vmatprep.subr.bf16.mxu1 %v2483_v1 }
 0x3f8   : > { %v1513_v9 = vpop.f32.mrb[32].mxu0 }
 0x3f9   : > { %v1657_v10 = vpack.c.bf16 %v1513_v9, %v1513_v9  ;;  %v2257_v11 = vpop.f32.mrb[33].mxu0 }
 0x3fa   : > { %v1516_v13 = vpop.f32.mrb[34].mxu0  ;;  %v2068_v11 = vld [vmem:[%s2975_s11] ss:$0 sm:$0xff] }
 0x3fb   : > { %v2258_v15 = vpop.f32.mrb[35].mxu0  ;;  %2280 = vmatmul.mubr.msk.bf16.vlgmr.msra.gmra.mrb[40].mxu0 %vm1219_vm2, %v1657_v10 }
 0x3fc   : > { %v1559_v16 = vpop.f32.mrb[32].mxu1  ;;  %2290 = vmatpush3.bf16.msra.mxu0 %v1761_v12  ;;  %2291 = vmatprep.mubr.msk.bf16.mxu0 %vm2484_vm0, %v2483_v1 }
 0x3fd   : > { %v1658_v17 = vpack.c.bf16 %v1559_v16, %v1559_v16  ;;  %v2263_v18 = vpop.f32.mrb[33].mxu1 }
 0x3fe   : > { %v1562_v20 = vpop.f32.mrb[34].mxu1 }
 0x3ff   : > { %v2264_v21 = vpop.f32.mrb[35].mxu1  ;;  %2286 = vmatmul.mubr.msk.bf16.vlgmr.msra.gmra.mrb[40].mxu1 %vm1219_vm2, %v1658_v17 }
 0x400   : > { %v1605_v22 = vpop.f32.mrb[36].mxu0  ;;  %2296 = vmatpush3.bf16.msra.mxu1 %v1807_v19  ;;  %2297 = vmatprep.mubr.msk.bf16.mxu1 %vm2484_vm0, %v2483_v1 }
 0x401   : > { %v1659_v23 = vpack.c.bf16 %v1605_v22, %v1605_v22  ;;  %v2269_v24 = vpop.f32.mrb[37].mxu0 }
 0x402   : > { %v1608_v25 = vpop.f32.mrb[38].mxu0 }
 0x403   : > { %v2270_v26 = vpop.f32.mrb[39].mxu0  ;;  %2292 = vmatmul.mubr.msk.bf16.vlgmr.msra.gmra.mrb[44].mxu0 %vm1219_vm2, %v1659_v23 }
 0x404   : > { %v1651_v27 = vpop.f32.mrb[36].mxu1 }
 0x405   : > { %v1660_v28 = vpack.c.bf16 %v1651_v27, %v1651_v27  ;;  %v2275_v29 = vpop.f32.mrb[37].mxu1 }
 0x406   : > { %v1654_v30 = vpop.f32.mrb[38].mxu1 }
 0x407   : > { %v2276_v31 = vpop.f32.mrb[39].mxu1  ;;  %2298 = vmatmul.mubr.msk.bf16.vlgmr.msra.gmra.mrb[44].mxu1 %vm1219_vm2, %v1660_v28 }
 0x4ce   : > { %v1705_v32 = vpop.f32.mrb[40].mxu0 }
 0x4cf   : > { %v2281_v33 = vpop.f32.mrb[41].mxu0  ;;  %v1849_v1 = vsel %vm507_vm1, %v1705_v32, 0.0 }
 0x4d0   : > { %v1708_v34 = vpop.f32.mrb[42].mxu0 }
 0x4d1   : > { %v2282_v35 = vpop.f32.mrb[43].mxu0 }
 0x4d2   : > { %v1751_v36 = vpop.f32.mrb[40].mxu1 }
 0x4d3   : > { %v1850_v37 = vsel %vm507_vm1, %v1751_v36, 0.0  ;;  %v2287_v38 = vpop.f32.mrb[41].mxu1 }
 0x4d4   : > { %v1851_v39 = vadd.f32 %v1850_v37, %v1849_v1  ;;  %v1754_v40 = vpop.f32.mrb[42].mxu1 }
 0x4d5   : > { %v2288_v43 = vpop.f32.mrb[43].mxu1 }
 0x4d6   : > { %v1797_v44 = vpop.f32.mrb[44].mxu0 }
 0x4d7   : > { %v1852_v45 = vsel %vm507_vm1, %v1797_v44, 0.0  ;;  %v2293_v46 = vpop.f32.mrb[45].mxu0 }
 0x4d8   : > { %v1853_v47 = vadd.f32 %v1852_v45, %v1851_v39  ;;  %v1800_v48 = vpop.f32.mrb[46].mxu0 }
 0x4d9   : > { %v2294_v49 = vpop.f32.mrb[47].mxu0 }
 0x4da   : > { %v1843_v50 = vpop.f32.mrb[44].mxu1 }
 0x4db   : > { %v1854_v51 = vsel %vm507_vm1, %v1843_v50, 0.0  ;;  %v2299_v53 = vpop.f32.mrb[45].mxu1 }
 0x4dc   : > { %v1855_v54 = vadd.f32 %v1854_v51, %v1853_v47  ;;  %v1846_v55 = vpop.f32.mrb[46].mxu1 }
 0x4dd   : > { %v2300_v56 = vpop.f32.mrb[47].mxu1 }
 0x4de   : > { %v1863_v57 = vadd.f32 %v2066_v52, %v1855_v54 }
 0x4e0   : > { %v1864_v58 = vadd.f32 %v1863_v57, %v2642_v7 }
 0x4e2   : > { %v1867_v59 = vsel %vm507_vm1, %v1864_v58, 0.0 }
 0x4e3   : > { %1868 = vadd.xlane.f32.xlu0 %v1867_v59 }
 0x570   : > { %v1869_v41 = vpop.xlane.xlu0 %1868 }
 0x571   : > { %v1871_v60 = vmul.f32 0.03125, %v1869_v41 }
 0x573   : > { %v1872_v42 = vsub.f32 %v1864_v58, %v1871_v60 }
 0x575   : > { %v1873_v61 = vmul.f32 %v1872_v42, %v1872_v42  ;;  %v1892_v9 = vmul.f32 %v2067_v8, %v1872_v42 }
 0x577   : > { %v1874_v62 = vsel %vm507_vm1, %v1873_v61, 0.0 }
 0x578   : > { %1875 = vadd.xlane.f32.xlu1 %v1874_v62 }
 0x605   : > { %v1876_v63 = vpop.xlane.xlu1 %1875 }
 0x606   : > { %v1878_v0 = vmul.f32 0.032258064, %v1876_v63 }
 0x608   : > { %2399 = vrsqrt.f32 %v1878_v0  ;;  %vm1881_vm6 = vcmp.eq.f32.partialorder %v1878_v0, inf  ;;  %v1884_v4 = vand.u32 2147483648, %v1878_v0  ;;  %vm1883_vm7 = vcmp.eq.f32.partialorder %v1878_v0, 0.0 }
 0x612   : > { %v2400_v2 = vpop.eup %2399 }
 0x613   : > { %v1880_v3 = vmul.f32 %v2400_v2, %v1878_v0 }
 0x615   : > { %v1882_v7 = vsel %vm1881_vm6, %v1878_v0, %v1880_v3 }
 0x616   : > { %v1885_v5 = vsel %vm1883_vm7, %v1884_v4, %v1882_v7 }
 0x617   : > { %v1893_v6 = vadd.f32 1e-06, %v1885_v5 }
 0x619   : > { %2401 = vrcp.f32 %v1893_v6 }
 0x623   : > { %v2402_v10 = vpop.eup %2401 }
 0x624   : > { %v1895_v12 = vmul.f32 %v2402_v10, %v1892_v9 }
 0x626   : > { %v1902_v13 = vadd.f32 %v2068_v11, %v1895_v12 }
 0x628   : > { %1903 = vst.msk [vmem:[%s437_s28] sm:$0xff] %vm507_vm1, %v1902_v13 }
 0x629   : > { %2416 = shalt.err (!%p2413_p5)
}
 0x62a   : > { %s2417_s0 = scalar_lea.hbm %s2916_s2, 128  ;;  %s2421_s20 = scalar_lea.hbm %s2976_s12, 256 }
 0x62b   : > { %p2418_p6 = scmp.ne.s32.totalorder %s2916_s2, %s2417_s0  ;;  %p2422_p10 = scmp.lt.u32.totalorder %s2916_s2, %s2976_s12 }
 0x62c   : > { %p2423_p11 = scmp.lt.u32.totalorder %s2421_s20, %s2417_s0  ;;  %p2425_p13 = scmp.lt.u32.totalorder %s2417_s0, %s2916_s2 }
 0x62d   : > { %p2419_p7 = pnand %p2418_p6, %p2592_p4 }
 0x62e   : > { %p2424_p12 = por %p2423_p11, %p2422_p10 }
 0x62f   : > { %p2420_p9 = pneg %p2419_p7 }
 0x630   : > { %p2426_p0 = por %p2425_p13, %p2424_p12 }
 0x632   : > { %p2427_p1 = pnand %p2426_p0, %p2420_p9 }
 0x634   : > { %2430 = shalt.err (!%p2427_p1)
}
 0x635   : > { %2301 = dma.vmem_to_hbm [thread:$0]  (%p2592_p4), %s2918_s30, 128, %s2916_s2, %s1905_s19  }
 0x636 PF: > { %p2307_p2 = scmp.ge.s32.totalorder %s2481_s26, 2  ;;  %s1931_s29 = sand.u32 1, %s2461_s21  }
 0x637   : > { %s1932_s24 = scalar_lea.sflag [#allocation3], %s1931_s29 }
 0x638   : > { %p2304_p3 = pnand %p2307_p2, %p2599_p8 }
 0x63a   : > { %2456 = dma.done.wait (!%p2304_p3), %s1932_s24, 128  }
 0x63b   : > { %2458 = vsyncadd (!%p2304_p3), %s1932_s24, 4294967168  ;;  %s25_s26 = sadd.s32 1, %s2481_s26   ;;  %s2987_s13 = sld [smem:[#allocation5_spill]] }
 0x63c   : > { %p22_p5 = scmp.ge.s32.totalorder %s25_s26, 4   ;;  %s2988_s21 = smov %s2465_s22 }
 0x63d   : > { %s2989_s22 = smov %s2469_s23  ;;  %s2990_s23 = smov %s2605_s16 }
 0x63e   : > { %s2991_s24 = smov %s2477_s25  ;;  %24 = sbr.rel (!%p22_p5) target bundleno = 8 (0x8), region = 106 }
 0x641   : > { %s2992_s25 = smov %s2987_s13 }
 0x645   :  { %1937 = vsyncpa [#allocation3], 1 }
 0x646   :  { %1939 = vsyncpa [#allocation3 + $0x1], 1 }

</bundles_post_ra>
